<compile_context>
chip_gen: v7x
topology: tpu7x:2x2x1
jax: 0.10.0
libtpu: 0.0.40
codegen_flags: <defaults>
</compile_context>

<pallas_src>
import functools
import math

import jax
import jax.numpy as jnp
from jax.experimental import pallas as pl
from jax.experimental.pallas import tpu as pltpu


_UNROLL_CAP = 16  # max statically-unrolled batch columns per block


# ---------------------------------------------------------------------------
# Kernels
# ---------------------------------------------------------------------------

def _pe_add_kernel_lanedense(scale_ref, x_ref, pe_ref, o_ref, *, tile_b, d_model):
    """Fast path (D % 128 == 0): lane-dense (tile_s, tile_b*D) blocks.

    scale_ref: SMEM (1,) f32
    x_ref    : VMEM (tile_s, tile_b*D)  x.dtype
    pe_ref   : VMEM (tile_s, D)         f32 (faithful to the torch buffer)
    o_ref    : VMEM (tile_s, tile_b*D)  x.dtype
    """
    s = scale_ref[0]
    # scale * pe once per tile in f32, single cast to the native compute dtype
    # (bf16-native add on v6e/v7x; exact no-op for f32 inputs).
    pe = (s * pe_ref[...]).astype(o_ref.dtype)                     # (tile_s, D)
    # Broadcast over the per-block batch via static, 128-aligned column slices
    # of the flattened lane axis.  tile_b <= _UNROLL_CAP keeps the unroll tiny.
    for b in range(tile_b):                                        # static unroll
        col = slice(b * d_model, (b + 1) * d_model)
        o_ref[:, col] = x_ref[:, col] + pe


def _pe_add_kernel_3d(scale_ref, x_ref, pe_ref, o_ref):
    """General path (D % 128 != 0): 3-D blocks, broadcast pe over batch axis."""
    s = scale_ref[0]
    pe = (s * pe_ref[...]).astype(o_ref.dtype)                     # (tile_s, 1, D)
    o_ref[...] = x_ref[...] + pe                                    # bcast over B


# ---------------------------------------------------------------------------
# Tiling policy
# ---------------------------------------------------------------------------

def _vmem_capacity_bytes() -> int:
    try:
        info = pltpu.get_tpu_info()
        for attr in ("vmem_capacity_bytes", "vmem_size_bytes", "vmem_bytes"):
            v = getattr(info, attr, None)
            if v:
                return int(v)
    except Exception:
        pass
    return 64 << 20  # conservative: v7x per-TC physical VMEM


def _tiling_budget():
    """Returns (target_block_bytes, vmem_limit_bytes), generation aware."""
    phys = _vmem_capacity_bytes()
    if phys >= (96 << 20):              # v5e / v6e: 128 MiB physical VMEM
        return 12 << 20, 80 << 20
    return 8 << 20, 48 << 20            # v7x: 64 MiB per TensorCore


def _choose_tile_b(B, D, itemsize, gran, target_block_bytes):
    """Largest divisor of B (<= unroll cap) whose minimal block fits the target."""
    best = 1
    for t in range(1, min(B, _UNROLL_CAP) + 1):
        if B % t == 0 and gran * t * D * itemsize <= target_block_bytes:
            best = t
    return best


def _choose_tile_s(S, gran, row_bytes, target_block_bytes, min_steps=4):
    """Pick a sequence tile (multiple of `gran`) and the padded sequence length.

    Aims for blocks near `target_block_bytes` while keeping >= `min_steps` grid
    steps along the sequence axis so that v7x megacore sharding still leaves
    >= 2 pipelined steps per TensorCore.
    """
    S_pad = ((S + gran - 1) // gran) * gran
    cands = [t for t in range(gran, S_pad + 1, gran) if S_pad % t == 0]
    fitting = [t for t in cands if t * row_bytes <= target_block_bytes]
    if not fitting:
        # Rows too wide even for the minimal tile; rely on vmem_limit headroom.
        # TODO(synk): split the d_model axis as a third grid dim for this case.
        return gran, S_pad
    tile = max(fitting)
    if S_pad // tile < min_steps:
        multi = [t for t in fitting if S_pad // t >= min_steps]
        if multi:
            tile = max(multi)
    return tile, S_pad


# ---------------------------------------------------------------------------
# Host-side table + wrapper
# ---------------------------------------------------------------------------

def make_pe_table(d_model: int, max_len: int) -> jnp.ndarray:
    """Deterministic sinusoidal table, identical to the PyTorch buffer."""
    position = jnp.arange(0, max_len, dtype=jnp.float32)[:, None]           # (L, 1)
    div_term = jnp.exp(
        jnp.arange(0, d_model, 2, dtype=jnp.float32) * (-math.log(10000.0) / d_model)
    )                                                                        # (D/2,)
    pe = jnp.zeros((max_len, d_model), dtype=jnp.float32)
    pe = pe.at[:, 0::2].set(jnp.sin(position * div_term))
    pe = pe.at[:, 1::2].set(jnp.cos(position * div_term))
    # torch: pe.unsqueeze(0).transpose(0, 1) -> (max_len, 1, d_model)
    return pe[:, None, :]


def positional_encoding(x: jnp.ndarray, pe_table: jnp.ndarray, scale: jnp.ndarray,
                        *, tile_s: int | None = None,
                        vmem_limit_bytes: int | None = None,
                        donate_x: bool = False) -> jnp.ndarray:
    """x: (S, B, D); pe_table: (max_len, 1, D) f32; scale: (1,) f32."""
    S, B, D = x.shape
    itemsize = jnp.dtype(x.dtype).itemsize

    target_block, vmem_default = _tiling_budget()
    if vmem_limit_bytes is None:
        vmem_limit_bytes = vmem_default

    scale = jnp.asarray(scale, dtype=jnp.float32).reshape((1,))
    pe_f32 = pe_table[:S, 0, :].astype(jnp.float32)                 # (S, D), keep f32

    # dtype-aware sublane granularity: 8 f32, 16 bf16/f16, 32 int8/fp8.
    gran = 8 * max(1, 4 // itemsize)

    cost = pl.CostEstimate(
        flops=2 * S * B * D,
        transcendentals=0,
        bytes_accessed=2 * S * B * D * itemsize + S * D * 4,
    )
    io_alias = {1: 0} if donate_x else {}

    if D % 128 == 0:
        # ---------------- fast lane-dense path ----------------------------
        tile_b = _choose_tile_b(B, D, itemsize, gran, target_block)
        row_bytes = tile_b * D * itemsize
        if tile_s is None:
            tile_s, S_pad = _choose_tile_s(S, gran, row_bytes, target_block)
        else:
            assert tile_s % gran == 0 or tile_s == S, (
                f"tile_s={tile_s} must be a multiple of {gran} (or == S={S})")
            S_pad = ((S + tile_s - 1) // tile_s) * tile_s

        x2 = x.reshape(S, B * D)                   # contiguous merge: free
        pe2 = pe_f32
        if S_pad != S:
            x2 = jnp.pad(x2, ((0, S_pad - S), (0, 0)))
            pe2 = jnp.pad(pe2, ((0, S_pad - S), (0, 0)))

        grid = (S_pad // tile_s, B // tile_b)      # batch inner -> pe block reused
        kernel = functools.partial(_pe_add_kernel_lanedense, tile_b=tile_b, d_model=D)

        out2 = pl.pallas_call(
            kernel,
            out_shape=jax.ShapeDtypeStruct((S_pad, B * D), x.dtype),
            grid_spec=pltpu.PrefetchScalarGridSpec(
                num_scalar_prefetch=0,
                grid=grid,
                in_specs=[
                    pl.BlockSpec(memory_space=pltpu.MemorySpace.SMEM),          # scale
                    pl.BlockSpec((tile_s, tile_b * D), lambda i, j: (i, j)),    # x
                    pl.BlockSpec((tile_s, D), lambda i, j: (i, 0)),             # pe
                ],
                out_specs=pl.BlockSpec((tile_s, tile_b * D), lambda i, j: (i, j)),
            ),
            compiler_params=pltpu.CompilerParams(
                dimension_semantics=("parallel", "parallel"),
                vmem_limit_bytes=vmem_limit_bytes,
            ),
            cost_estimate=cost,
            input_output_aliases=io_alias,
        )(scale, x2, pe2)
        return out2[:S].reshape(S, B, D)

    # -------------------- general 3-D broadcast path ----------------------
    # D not a multiple of 128: column slicing of a flattened (B*D) axis would
    # straddle lanes, so use full (tile_s, B, D) blocks and a broadcast add.
    row_bytes = B * D * itemsize
    if tile_s is None:
        tile_s, S_pad = _choose_tile_s(S, 8, row_bytes, target_block)
    else:
        S_pad = ((S + tile_s - 1) // tile_s) * tile_s

    x3 = x
    pe3 = pe_f32[:, None, :]                                        # (S, 1, D)
    if S_pad != S:
        x3 = jnp.pad(x3, ((0, S_pad - S), (0, 0), (0, 0)))
        pe3 = jnp.pad(pe3, ((0, S_pad - S), (0, 0), (0, 0)))

    out3 = pl.pallas_call(
        _pe_add_kernel_3d,
        out_shape=jax.ShapeDtypeStruct((S_pad, B, D), x.dtype),
        grid_spec=pltpu.PrefetchScalarGridSpec(
            num_scalar_prefetch=0,
            grid=(S_pad // tile_s,),
            in_specs=[
                pl.BlockSpec(memory_space=pltpu.MemorySpace.SMEM),              # scale
                pl.BlockSpec((tile_s, B, D), lambda i: (i, 0, 0)),              # x
                pl.BlockSpec((tile_s, 1, D), lambda i: (i, 0, 0)),              # pe
            ],
            out_specs=pl.BlockSpec((tile_s, B, D), lambda i: (i, 0, 0)),
        ),
        compiler_params=pltpu.CompilerParams(
            dimension_semantics=("parallel",),
            vmem_limit_bytes=vmem_limit_bytes,
        ),
        cost_estimate=cost,
        input_output_aliases=io_alias,
    )(scale, x3, pe3)
    return out3[:S]


if __name__ == "__main__":
    key = jax.random.PRNGKey(0)
    MAX_LEN = 64

    # 1) f32, lane-dense fast path (D % 128 == 0), auto tiling.
    S, B, D = 16, 2, 128
    x = jax.random.normal(key, (S, B, D), dtype=jnp.float32)
    scale = jnp.ones((1,), dtype=jnp.float32)          # nn.Parameter(torch.ones(1))
    pe_tab = make_pe_table(D, MAX_LEN)                 # registered buffer
    ref = x + scale[0] * pe_tab[:S]

    out = jax.block_until_ready(positional_encoding(x, pe_tab, scale))
    assert out.shape == (S, B, D)
    assert jnp.allclose(out, ref, atol=1e-6, rtol=1e-6)

    # 2) explicit multi-step sequence grid (tile_s=8) to exercise pipelining.
    out2 = jax.block_until_ready(positional_encoding(x, pe_tab, scale, tile_s=8))
    assert jnp.allclose(out2, ref, atol=1e-6, rtol=1e-6)

    # 3) bf16 input: native bf16 add (no f32 round-trip of x).
    xb = x.astype(jnp.bfloat16)
    refb = xb + (scale[0] * pe_tab[:S, 0, :]).astype(jnp.bfloat16)[:, None, :]
    outb = jax.block_until_ready(positional_encoding(xb, pe_tab, scale))
    assert outb.dtype == jnp.bfloat16
    assert jnp.allclose(outb.astype(jnp.float32), refb.astype(jnp.float32),
                        atol=1e-2, rtol=1e-2)

    # 4) d_model not a multiple of 128 -> 3-D broadcast fallback path.
    S2, B2, D2 = 16, 2, 96
    x96 = jax.random.normal(jax.random.PRNGKey(1), (S2, B2, D2), dtype=jnp.float32)
    pe96 = make_pe_table(D2, MAX_LEN)
    ref96 = x96 + scale[0] * pe96[:S2]
    out96 = jax.block_until_ready(positional_encoding(x96, pe96, scale))
    assert jnp.allclose(out96, ref96, atol=1e-6, rtol=1e-6)

    # 5) ragged sequence length (S=13) -> padded grid, result sliced back.
    S3 = 13
    x13 = jax.random.normal(jax.random.PRNGKey(2), (S3, B, D), dtype=jnp.float32)
    ref13 = x13 + scale[0] * pe_tab[:S3]
    out13 = jax.block_until_ready(positional_encoding(x13, pe_tab, scale))
    assert out13.shape == (S3, B, D)
    assert jnp.allclose(out13, ref13, atol=1e-6, rtol=1e-6)

    print("KERNEL_OK")
</pallas_src>

<mosaic_0001>
module attributes {stable_mosaic.version = 11 : i64} {
  func.func @_pe_add_kernel_lanedense(%arg0: i32, %arg1: i32, %arg2: memref<1xf32, #tpu.memory_space<smem>>, %arg3: memref<16x256xf32, #tpu.memory_space<vmem>>, %arg4: memref<16x128xf32, #tpu.memory_space<vmem>>, %arg5: memref<16x256xf32, #tpu.memory_space<vmem>>) attributes {dimension_semantics = [#tpu.dimension_semantics<parallel>, #tpu.dimension_semantics<parallel>], iteration_bounds = array<i64: 1, 1>, scalar_prefetch = 0 : i64, scratch_operands = 0 : i64, tpu.core_type = #tpu.core_type<tc>, window_params = [{transform_indices = @transform_0, window_bounds = array<i64: 1>}, {transform_indices = @transform_1, window_bounds = array<i64: 16, 256>}, {transform_indices = @transform_2, window_bounds = array<i64: 16, 128>}, {transform_indices = @transform_3, window_bounds = array<i64: 16, 256>}]} {
    %c0 = arith.constant 0 : index
    %0 = memref.load %arg2[%c0] : memref<1xf32, #tpu.memory_space<smem>>
    %c0_0 = arith.constant 0 : index
    %c0_1 = arith.constant 0 : index
    %1 = vector.load %arg4[%c0_0, %c0_1] : memref<16x128xf32, #tpu.memory_space<vmem>>, vector<16x128xf32>
    %2 = vector.broadcast %0 : f32 to vector<16x128xf32>
    %3 = arith.mulf %2, %1 : vector<16x128xf32>
    %c0_2 = arith.constant 0 : index
    %c0_3 = arith.constant 0 : index
    %4 = vector.load %arg3[%c0_2, %c0_3] : memref<16x256xf32, #tpu.memory_space<vmem>>, vector<16x128xf32>
    %5 = arith.addf %4, %3 : vector<16x128xf32>
    %c0_4 = arith.constant 0 : index
    %c0_5 = arith.constant 0 : index
    %6 = vector.load %arg5[%c0_4, %c0_5] : memref<16x256xf32, #tpu.memory_space<vmem>>, vector<16x128xf32>
    tpu.vector_store %arg5[%c0_4, %c0_5], %5 {strides = array<i32>} : memref<16x256xf32, #tpu.memory_space<vmem>>, vector<16x128xf32>,
    %c0_6 = arith.constant 0 : index
    %c128 = arith.constant 128 : index
    %7 = vector.load %arg3[%c0_6, %c128] : memref<16x256xf32, #tpu.memory_space<vmem>>, vector<16x128xf32>
    %8 = arith.addf %7, %3 : vector<16x128xf32>
    %c0_7 = arith.constant 0 : index
    %c128_8 = arith.constant 128 : index
    %9 = vector.load %arg5[%c0_7, %c128_8] : memref<16x256xf32, #tpu.memory_space<vmem>>, vector<16x128xf32>
    tpu.vector_store %arg5[%c0_7, %c128_8], %8 {strides = array<i32>} : memref<16x256xf32, #tpu.memory_space<vmem>>, vector<16x128xf32>,
    return
  }
  func.func @transform_0(%arg0: i32, %arg1: i32) -> i32 {
    %c0_i32 = arith.constant 0 : i32
    %c0_i32_0 = arith.constant 0 : i32
    return %c0_i32 : i32
  }
  func.func @transform_1(%arg0: i32, %arg1: i32) -> (i32, i32) {
    %c0_i32 = arith.constant 0 : i32
    return %arg0, %arg1 : i32, i32
  }
  func.func @transform_2(%arg0: i32, %arg1: i32) -> (i32, i32) {
    %c0_i32 = arith.constant 0 : i32
    %c0_i32_0 = arith.constant 0 : i32
    return %arg0, %c0_i32 : i32, i32
  }
  func.func @transform_3(%arg0: i32, %arg1: i32) -> (i32, i32) {
    %c0_i32 = arith.constant 0 : i32
    return %arg0, %arg1 : i32, i32
  }
}

</mosaic_0001>

<bundles_post_ra>
// kernel: tpu_custom_call.1
= control target key start
LH: loop header
LB: loop body
LE: loop exit
PB: predicated region body
PF: predicated region fallthrough
CT: control target
= control target key end

     0   :  { %9 = vsyncpa [#allocation4], 0  ;;  %s231_s0 = inlined_call_operand.<no memory space> [shape: f32[1], index: 0, kind: input, shape index: {}]   ;;  %s232_s1 = inlined_call_operand.hbm [shape: f32[16,256], index: 1, kind: input, shape index: {}]   ;;  %s233_s2 = inlined_call_operand.hbm [shape: f32[16,128], index: 2, kind: input, shape index: {}]   ;;  %s234_s3 = inlined_call_operand.hbm [shape: f32[16,256], index: 3, kind: output, shape index: {}]  }
   0x1   :  { %10 = vsyncpa [#allocation7], 0 }
   0x2   :  { %11 = vsyncpa [#allocation5], 0  ;;  %s159_s12 = smov [#allocation3]   ;;  %s87_s16 = scalar_lea.hbm %s232_s1, 512 }
   0x3   :  { %s19_s13 = sshll.u32 %s159_s12, 4  ;;  %p88_p0 = scmp.ne.s32.totalorder %s232_s1, %s87_s16  ;;  %s20_s13 = int_to_ptr.vmem [resolvable:$true] %s19_s13 }
   0x4   :  { %p91_p1 = scmp.lt.u32.totalorder %s87_s16, %s232_s1 }
   0x6   :  { %p93_p2 = pnand %p91_p1, %p88_p0 }
   0x8   :  { %96 = shalt.err (!%p93_p2)
}
   0x9   :  { %s97_s21 = scalar_lea.vmem %s20_s13, 512  ;;  %p102_p4 = scmp.lt.s32.totalorder %s20_s13, %s20_s13 }
   0xa   :  { %p98_p3 = scmp.ne.s32.totalorder %s20_s13, %s97_s21  ;;  %p103_p5 = scmp.lt.s32.totalorder %s97_s21, %s97_s21 }
   0xc   :  { %p104_p6 = por %p103_p5, %p102_p4 }
   0xe   :  { %p105_p7 = pnand %p104_p6, %p98_p3 }
  0x10   :  { %108 = shalt.err (!%p105_p7)
}
  0x11   :  { %s160_s22 = smov 256   ;;  %s161_s23 = smov 16  }
  0x12   :  { %25 = dma.hbm_to_vmem [thread:$0]  %s232_s1, 512, %s20_s13, [#allocation4], %s160_s22, %s160_s22, %s161_s23  }
  0x13   :  { %s162_s26 = smov [#allocation6]   ;;  %s109_s30 = scalar_lea.hbm %s233_s2, 256 }
  0x14   :  { %s31_s27 = sshll.u32 %s162_s26, 4  ;;  %p110_p8 = scmp.ne.s32.totalorder %s233_s2, %s109_s30  ;;  %s32_s27 = int_to_ptr.vmem [resolvable:$true] %s31_s27 }
  0x15   :  { %p113_p9 = scmp.lt.u32.totalorder %s109_s30, %s233_s2 }
  0x17   :  { %p115_p10 = pnand %p113_p9, %p110_p8 }
  0x19   :  { %118 = shalt.err (!%p115_p10)
}
  0x1a   :  { %s119_s8 = scalar_lea.vmem %s32_s27, 256  ;;  %p124_p12 = scmp.lt.s32.totalorder %s32_s27, %s32_s27 }
  0x1b   :  { %p120_p11 = scmp.ne.s32.totalorder %s32_s27, %s119_s8  ;;  %p125_p13 = scmp.lt.s32.totalorder %s119_s8, %s119_s8 }
  0x1d   :  { %p126_p0 = por %p125_p13, %p124_p12 }
  0x1f   :  { %p127_p1 = pnand %p126_p0, %p120_p11 }
  0x21   :  { %130 = shalt.err (!%p127_p1)
}
  0x22   :  { %s163_s1 = smov 128   ;;  %s164_s9 = smov 8  }
  0x23   :  { %37 = dma.hbm_to_vmem [thread:$0]  %s233_s2, 256, %s32_s27, [#allocation7], %s163_s1, %s163_s1, %s164_s9  }
  0x24   :  { %153 = dma.done.wait [#allocation4], 512  }
  0x25   :  { %154 = vsyncadd [#allocation4], 4294966784 }
  0x26   :  { %155 = dma.done.wait [#allocation7], 256  }
  0x27   :  { %156 = vsyncadd [#allocation7], 4294967040  ;;  %v47_v0 = vstv %s231_s0  ;;  %v45_v1 = vld [vmem:[#allocation6] sm:$0xff]  ;;  %v46_v3 = vld [vmem:[#allocation6 + $0x8] sm:$0xff]  ;;  %s165_s14 = smov [#allocation8]  }
  0x28   :  { %v50_v2 = vld [vmem:[#allocation3] sm:$0xff]  ;;  %s67_s15 = sshll.u32 %s165_s14, 4  ;;  %v48_v4 = vmul.f32 %v47_v0, %v45_v1  ;;  %v49_v5 = vmul.f32 %v47_v0, %v46_v3  ;;  %v51_v6 = vld [vmem:[#allocation3 + $0x10] sm:$0xff]  ;;  %v56_v7 = vld [vmem:[#allocation3 + $0x8] sm:$0xff]  ;;  %s68_s15 = int_to_ptr.vmem [resolvable:$true] %s67_s15 }
  0x29   :  { %v57_v8 = vld [vmem:[#allocation3 + $0x18] sm:$0xff]  ;;  %s131_s0 = scalar_lea.vmem %s68_s15, 512  ;;  %p136_p3 = scmp.lt.s32.totalorder %s68_s15, %s68_s15 }
  0x2a   :  { %v52_v9 = vadd.f32 %v50_v2, %v48_v4  ;;  %v53_v10 = vadd.f32 %v51_v6, %v49_v5  ;;  %v58_v11 = vadd.f32 %v56_v7, %v48_v4  ;;  %v59_v12 = vadd.f32 %v57_v8, %v49_v5  ;;  %p132_p2 = scmp.ne.s32.totalorder %s68_s15, %s131_s0  ;;  %p137_p4 = scmp.lt.s32.totalorder %s131_s0, %s131_s0 }
  0x2c   :  { %54 = vst [vmem:[#allocation8] sm:$0xff] %v52_v9  ;;  %55 = vst [vmem:[#allocation8 + $0x10] sm:$0xff] %v53_v10  ;;  %p138_p5 = por %p137_p4, %p136_p3 }
  0x2d   :  { %60 = vst [vmem:[#allocation8 + $0x8] sm:$0xff] %v58_v11  ;;  %61 = vst [vmem:[#allocation8 + $0x18] sm:$0xff] %v59_v12 }
  0x2e   :  { %p139_p6 = pnand %p138_p5, %p132_p2 }
  0x30   :  { %142 = shalt.err (!%p139_p6)
}
  0x31   :  { %s143_s17 = scalar_lea.hbm %s234_s3, 512 }
  0x32   :  { %p144_p7 = scmp.ne.s32.totalorder %s234_s3, %s143_s17  ;;  %p147_p8 = scmp.lt.u32.totalorder %s143_s17, %s234_s3 }
  0x34   :  { %p149_p9 = pnand %p147_p8, %p144_p7 }
  0x36   :  { %152 = shalt.err (!%p149_p9)
}
  0x37   :  { %73 = dma.vmem_to_hbm [thread:$0]  %s68_s15, 512, %s234_s3, [#allocation5], %s160_s22, %s160_s22, %s161_s23  }
  0x38   :  { %157 = dma.done.wait [#allocation5], 512  }
  0x39   :  { %158 = vsyncadd [#allocation5], 4294966784 }
  0x3a   :  { %77 = vsyncpa [#allocation4], 1 }
  0x3b   :  { %78 = vsyncpa [#allocation7], 1 }
  0x3c   :  { %79 = vsyncpa [#allocation5], 1 }

</bundles_post_ra>
